<compile_context>
chip_gen: v7x
topology: tpu7x:2x2x1
jax: 0.10.0
libtpu: 0.0.40
codegen_flags: <defaults>
</compile_context>

<pallas_src>
import functools

import jax
import jax.numpy as jnp
from jax.experimental import pallas as pl
from jax.experimental.pallas import tpu as pltpu

NEG_SLOPE = 0.01  # nn.LeakyReLU default


def _leaky_relu(v):
    return jnp.where(v >= 0, v, NEG_SLOPE * v)


def _round_up(n, m):
    return ((n + m - 1) // m) * m


def classifier_kernel(x_ref, w1_ref, b1_ref, w2_ref, b2_ref, w3_ref, b3_ref,
                      o_ref):
    x = x_ref[...]  # (TB, 400) bf16

    # fc1 + LeakyReLU (bf16 x bf16 -> f32 accumulate on the MXU)
    h = jnp.dot(x, w1_ref[...], preferred_element_type=jnp.float32)
    h = _leaky_relu(h + b1_ref[...])          # (TB, 128) f32

    # fc2 + LeakyReLU (f32; weights are tiny and VMEM-resident)
    h = jnp.dot(h, w2_ref[...], preferred_element_type=jnp.float32)
    h = _leaky_relu(h + b2_ref[...])          # (TB, 128) f32

    # fc3 + LeakyReLU
    h = jnp.dot(h, w3_ref[...], preferred_element_type=jnp.float32)
    h = _leaky_relu(h + b3_ref[...])          # (TB, 10) f32

    # Softmax over last dim (nn.Softmax() on 2-D input defaults to dim=1)
    m = jnp.max(h, axis=-1, keepdims=True)
    e = jnp.exp(h - m)
    denom = jnp.sum(e, axis=-1, keepdims=True)
    o_ref[...] = (e * pl.reciprocal(denom, approx=True)).astype(o_ref.dtype)


def classifier_forward(x, params, *, block_b=512):
    """x: (B, 400) float32 -> (B, 10) float32 softmax probabilities."""
    w1, b1, w2, b2, w3, b3 = params  # logical (PyTorch-equivalent) shapes
    B = x.shape[0]

    # --- pad hidden widths to lane-friendly 128 (zero pads are exact) ------
    H1, H2 = 128, 128
    w1p = jnp.pad(w1, ((0, 0), (0, H1 - w1.shape[1]))).astype(jnp.bfloat16)
    b1p = jnp.pad(b1, ((0, 0), (0, H1 - b1.shape[1])))
    w2p = jnp.pad(w2, ((0, H1 - w2.shape[0]), (0, H2 - w2.shape[1])))
    b2p = jnp.pad(b2, ((0, 0), (0, H2 - b2.shape[1])))
    w3p = jnp.pad(w3, ((0, H2 - w3.shape[0]), (0, 0)))
    b3p = b3
    n_out = w3.shape[1]  # 10

    # --- cast the HBM-heavy input to bf16, pad batch to a tile multiple ----
    xb = x.astype(jnp.bfloat16)
    TB = min(block_b, _round_up(B, 8))
    Bp = _round_up(B, TB)
    if Bp != B:
        xb = jnp.pad(xb, ((0, Bp - B), (0, 0)))
    grid = (Bp // TB,)

    weight_bytes = (w1p.size * 2 + b1p.size * 4 + w2p.size * 4 +
                    b2p.size * 4 + w3p.size * 4 + b3p.size * 4)
    cost = pl.CostEstimate(
        flops=2 * Bp * (400 * H1 + H1 * H2 + H2 * n_out),
        transcendentals=Bp * n_out,
        bytes_accessed=Bp * 400 * 2 + Bp * n_out * 4 + weight_bytes,
    )

    out = pl.pallas_call(
        classifier_kernel,
        out_shape=jax.ShapeDtypeStruct((Bp, n_out), jnp.float32),
        grid=grid,
        in_specs=[
            pl.BlockSpec((TB, 400), lambda i: (i, 0)),      # x tile
            pl.BlockSpec((400, H1), lambda i: (0, 0)),      # w1 (resident)
            pl.BlockSpec((1, H1), lambda i: (0, 0)),        # b1
            pl.BlockSpec((H1, H2), lambda i: (0, 0)),       # w2
            pl.BlockSpec((1, H2), lambda i: (0, 0)),        # b2
            pl.BlockSpec((H2, n_out), lambda i: (0, 0)),    # w3
            pl.BlockSpec((1, n_out), lambda i: (0, 0)),     # b3
        ],
        out_specs=pl.BlockSpec((TB, n_out), lambda i: (i, 0)),
        compiler_params=pltpu.CompilerParams(
            dimension_semantics=("parallel",),
        ),
        cost_estimate=cost,
    )(xb, w1p, b1p, w2p, b2p, w3p, b3p)

    return out[:B]


def init_params(key):
    """Deterministic init mimicking nn.Linear's U(-1/sqrt(fan_in), +1/sqrt(fan_in))."""
    dims = [(400, 120), (120, 84), (84, 10)]
    params = []
    for i, (fan_in, fan_out) in enumerate(dims):
        kw, kb = jax.random.split(jax.random.fold_in(key, i))
        bound = 1.0 / (fan_in ** 0.5)
        w = jax.random.uniform(kw, (fan_in, fan_out), jnp.float32, -bound, bound)
        b = jax.random.uniform(kb, (1, fan_out), jnp.float32, -bound, bound)
        params += [w, b]
    return tuple(params)


def reference_forward(x, params, *, bf16_fc1=False):
    """Pure-JAX reference. bf16_fc1=True matches the kernel's fc1 dtypes."""
    w1, b1, w2, b2, w3, b3 = params
    xc = x.astype(jnp.bfloat16) if bf16_fc1 else x
    w1c = w1.astype(jnp.bfloat16) if bf16_fc1 else w1
    h = _leaky_relu(jnp.dot(xc, w1c, preferred_element_type=jnp.float32) + b1)
    h = _leaky_relu(jnp.dot(h, w2, preferred_element_type=jnp.float32) + b2)
    h = _leaky_relu(jnp.dot(h, w3, preferred_element_type=jnp.float32) + b3)
    return jax.nn.softmax(h, axis=-1)


if __name__ == "__main__":
    key = jax.random.PRNGKey(0)
    kx, kp = jax.random.split(key)
    params = init_params(kp)

    # Small batch: single tile.
    B = 8
    x = jax.random.normal(kx, (B, 400), jnp.float32)
    out = jax.block_until_ready(classifier_forward(x, params))

    ref_match = reference_forward(x, params, bf16_fc1=True)
    ref_f32 = reference_forward(x, params)
    assert out.shape == (B, 10)
    assert jnp.allclose(jnp.sum(out, axis=-1), 1.0, atol=5e-3)
    assert jnp.allclose(out, ref_match, atol=2e-3), "mismatch vs dtype-matched ref"
    assert jnp.allclose(out, ref_f32, atol=3e-2), "mismatch vs f32 ref"

    # Non-multiple-of-tile batch: exercises the multi-step grid + batch pad.
    B2 = 40
    x2 = jax.random.normal(jax.random.fold_in(kx, 1), (B2, 400), jnp.float32)
    out2 = jax.block_until_ready(classifier_forward(x2, params, block_b=16))
    ref2 = reference_forward(x2, params, bf16_fc1=True)
    assert out2.shape == (B2, 10)
    assert jnp.allclose(jnp.sum(out2, axis=-1), 1.0, atol=5e-3)
    assert jnp.allclose(out2, ref2, atol=2e-3)

    print("KERNEL_OK")
</pallas_src>

<mosaic_0001>
module attributes {stable_mosaic.version = 11 : i64} {
  func.func @classifier_kernel(%arg0: i32, %arg1: memref<8x400xbf16, #tpu.memory_space<vmem>>, %arg2: memref<400x128xbf16, #tpu.memory_space<vmem>>, %arg3: memref<1x128xf32, #tpu.memory_space<vmem>>, %arg4: memref<128x128xf32, #tpu.memory_space<vmem>>, %arg5: memref<1x128xf32, #tpu.memory_space<vmem>>, %arg6: memref<128x10xf32, #tpu.memory_space<vmem>>, %arg7: memref<1x10xf32, #tpu.memory_space<vmem>>, %arg8: memref<8x10xf32, #tpu.memory_space<vmem>>) attributes {dimension_semantics = [#tpu.dimension_semantics<parallel>], iteration_bounds = array<i64: 1>, scalar_prefetch = 0 : i64, scratch_operands = 0 : i64, tpu.core_type = #tpu.core_type<tc>, window_params = [{transform_indices = @transform_0, window_bounds = array<i64: 8, 400>}, {pipeline_mode = #tpu.pipeline_mode<synchronous>, transform_indices = @transform_1, window_bounds = array<i64: 400, 128>}, {pipeline_mode = #tpu.pipeline_mode<synchronous>, transform_indices = @transform_2, window_bounds = array<i64: 1, 128>}, {pipeline_mode = #tpu.pipeline_mode<synchronous>, transform_indices = @transform_3, window_bounds = array<i64: 128, 128>}, {pipeline_mode = #tpu.pipeline_mode<synchronous>, transform_indices = @transform_4, window_bounds = array<i64: 1, 128>}, {pipeline_mode = #tpu.pipeline_mode<synchronous>, transform_indices = @transform_5, window_bounds = array<i64: 128, 10>}, {pipeline_mode = #tpu.pipeline_mode<synchronous>, transform_indices = @transform_6, window_bounds = array<i64: 1, 10>}, {transform_indices = @transform_7, window_bounds = array<i64: 8, 10>}]} {
    %c0 = arith.constant 0 : index
    %c0_0 = arith.constant 0 : index
    %0 = vector.load %arg1[%c0, %c0_0] : memref<8x400xbf16, #tpu.memory_space<vmem>>, vector<8x400xbf16>
    %c0_1 = arith.constant 0 : index
    %c0_2 = arith.constant 0 : index
    %1 = vector.load %arg2[%c0_1, %c0_2] : memref<400x128xbf16, #tpu.memory_space<vmem>>, vector<400x128xbf16>
    %cst = arith.constant dense<0.000000e+00> : vector<8x128xf32>
    %2 = tpu.matmul %0, %1, %cst {dimension_numbers = #tpu.dot_dimension_numbers<[1], [0], [0], [1], [0, 0, 1, 1], [], []>} : vector<8x400xbf16>, vector<400x128xbf16>, vector<8x128xf32> -> vector<8x128xf32>
    %c0_3 = arith.constant 0 : index
    %c0_4 = arith.constant 0 : index
    %3 = vector.load %arg3[%c0_3, %c0_4] : memref<1x128xf32, #tpu.memory_space<vmem>>, vector<1x128xf32>
    %4 = vector.broadcast %3 : vector<1x128xf32> to vector<8x128xf32>
    %5 = arith.addf %2, %4 : vector<8x128xf32>
    %cst_5 = arith.constant 0.000000e+00 : f32
    %6 = vector.broadcast %cst_5 : f32 to vector<8x128xf32>
    %7 = arith.cmpf oge, %5, %6 : vector<8x128xf32>
    %cst_6 = arith.constant 0.00999999977 : f32
    %8 = vector.broadcast %cst_6 : f32 to vector<8x128xf32>
    %9 = arith.mulf %8, %5 : vector<8x128xf32>
    %10 = arith.select %7, %5, %9 : vector<8x128xi1>, vector<8x128xf32>
    %c0_7 = arith.constant 0 : index
    %c0_8 = arith.constant 0 : index
    %11 = vector.load %arg4[%c0_7, %c0_8] : memref<128x128xf32, #tpu.memory_space<vmem>>, vector<128x128xf32>
    %cst_9 = arith.constant dense<0.000000e+00> : vector<8x128xf32>
    %12 = tpu.matmul %10, %11, %cst_9 {dimension_numbers = #tpu.dot_dimension_numbers<[1], [0], [0], [1], [0, 0, 1, 1], [], []>} : vector<8x128xf32>, vector<128x128xf32>, vector<8x128xf32> -> vector<8x128xf32>
    %c0_10 = arith.constant 0 : index
    %c0_11 = arith.constant 0 : index
    %13 = vector.load %arg5[%c0_10, %c0_11] : memref<1x128xf32, #tpu.memory_space<vmem>>, vector<1x128xf32>
    %14 = vector.broadcast %13 : vector<1x128xf32> to vector<8x128xf32>
    %15 = arith.addf %12, %14 : vector<8x128xf32>
    %cst_12 = arith.constant 0.000000e+00 : f32
    %16 = vector.broadcast %cst_12 : f32 to vector<8x128xf32>
    %17 = arith.cmpf oge, %15, %16 : vector<8x128xf32>
    %cst_13 = arith.constant 0.00999999977 : f32
    %18 = vector.broadcast %cst_13 : f32 to vector<8x128xf32>
    %19 = arith.mulf %18, %15 : vector<8x128xf32>
    %20 = arith.select %17, %15, %19 : vector<8x128xi1>, vector<8x128xf32>
    %c0_14 = arith.constant 0 : index
    %c0_15 = arith.constant 0 : index
    %21 = vector.load %arg6[%c0_14, %c0_15] : memref<128x10xf32, #tpu.memory_space<vmem>>, vector<128x10xf32>
    %cst_16 = arith.constant dense<0.000000e+00> : vector<8x10xf32>
    %22 = tpu.matmul %20, %21, %cst_16 {dimension_numbers = #tpu.dot_dimension_numbers<[1], [0], [0], [1], [0, 0, 1, 1], [], []>} : vector<8x128xf32>, vector<128x10xf32>, vector<8x10xf32> -> vector<8x10xf32>
    %c0_17 = arith.constant 0 : index
    %c0_18 = arith.constant 0 : index
    %23 = vector.load %arg7[%c0_17, %c0_18] : memref<1x10xf32, #tpu.memory_space<vmem>>, vector<1x10xf32>
    %24 = vector.broadcast %23 : vector<1x10xf32> to vector<8x10xf32>
    %25 = arith.addf %22, %24 : vector<8x10xf32>
    %cst_19 = arith.constant 0.000000e+00 : f32
    %26 = vector.broadcast %cst_19 : f32 to vector<8x10xf32>
    %27 = arith.cmpf oge, %25, %26 : vector<8x10xf32>
    %cst_20 = arith.constant 0.00999999977 : f32
    %28 = vector.broadcast %cst_20 : f32 to vector<8x10xf32>
    %29 = arith.mulf %28, %25 : vector<8x10xf32>
    %30 = arith.select %27, %25, %29 : vector<8x10xi1>, vector<8x10xf32>
    %cst_21 = arith.constant dense<0xFF800000> : vector<8xf32>
    %31 = vector.multi_reduction <maximumf>, %30, %cst_21 [1] : vector<8x10xf32> to vector<8xf32>
    %32 = vector.shape_cast %31 : vector<8xf32> to vector<8x1xf32>
    %33 = vector.broadcast %32 : vector<8x1xf32> to vector<8x10xf32>
    %34 = arith.subf %30, %33 : vector<8x10xf32>
    %35 = math.exp %34 : vector<8x10xf32>
    %cst_22 = arith.constant dense<0.000000e+00> : vector<8xf32>
    %36 = vector.multi_reduction <add>, %35, %cst_22 [1] : vector<8x10xf32> to vector<8xf32>
    %37 = vector.shape_cast %36 : vector<8xf32> to vector<8x1xf32>
    %38 = tpu.reciprocal %37 {approx = true} : vector<8x1xf32> -> vector<8x1xf32>
    %39 = vector.broadcast %38 : vector<8x1xf32> to vector<8x10xf32>
    %40 = arith.mulf %35, %39 : vector<8x10xf32>
    %c0_23 = arith.constant 0 : index
    %c0_24 = arith.constant 0 : index
    %41 = vector.load %arg8[%c0_23, %c0_24] : memref<8x10xf32, #tpu.memory_space<vmem>>, vector<8x10xf32>
    tpu.vector_store %arg8[%c0_23, %c0_24], %40 {strides = array<i32>} : memref<8x10xf32, #tpu.memory_space<vmem>>, vector<8x10xf32>,
    return
  }
  func.func @transform_0(%arg0: i32) -> (i32, i32) {
    %c0_i32 = arith.constant 0 : i32
    %c0_i32_0 = arith.constant 0 : i32
    return %arg0, %c0_i32 : i32, i32
  }
  func.func @transform_1(%arg0: i32) -> (i32, i32) {
    %c0_i32 = arith.constant 0 : i32
    %c0_i32_0 = arith.constant 0 : i32
    %c0_i32_1 = arith.constant 0 : i32
    return %c0_i32, %c0_i32_0 : i32, i32
  }
  func.func @transform_2(%arg0: i32) -> (i32, i32) {
    %c0_i32 = arith.constant 0 : i32
    %c0_i32_0 = arith.constant 0 : i32
    %c0_i32_1 = arith.constant 0 : i32
    return %c0_i32, %c0_i32_0 : i32, i32
  }
  func.func @transform_3(%arg0: i32) -> (i32, i32) {
    %c0_i32 = arith.constant 0 : i32
    %c0_i32_0 = arith.constant 0 : i32
    %c0_i32_1 = arith.constant 0 : i32
    return %c0_i32, %c0_i32_0 : i32, i32
  }
  func.func @transform_4(%arg0: i32) -> (i32, i32) {
    %c0_i32 = arith.constant 0 : i32
    %c0_i32_0 = arith.constant 0 : i32
    %c0_i32_1 = arith.constant 0 : i32
    return %c0_i32, %c0_i32_0 : i32, i32
  }
  func.func @transform_5(%arg0: i32) -> (i32, i32) {
    %c0_i32 = arith.constant 0 : i32
    %c0_i32_0 = arith.constant 0 : i32
    %c0_i32_1 = arith.constant 0 : i32
    return %c0_i32, %c0_i32_0 : i32, i32
  }
  func.func @transform_6(%arg0: i32) -> (i32, i32) {
    %c0_i32 = arith.constant 0 : i32
    %c0_i32_0 = arith.constant 0 : i32
    %c0_i32_1 = arith.constant 0 : i32
    return %c0_i32, %c0_i32_0 : i32, i32
  }
  func.func @transform_7(%arg0: i32) -> (i32, i32) {
    %c0_i32 = arith.constant 0 : i32
    %c0_i32_0 = arith.constant 0 : i32
    return %arg0, %c0_i32 : i32, i32
  }
}

</mosaic_0001>

<bundles_post_ra>
// kernel: tpu_custom_call.1
= control target key start
LH: loop header
LB: loop body
LE: loop exit
PB: predicated region body
PF: predicated region fallthrough
CT: control target
= control target key end

     0   :  { %12 = vsyncpa [#allocation3], 0  ;;  %s1078_s0 = inlined_call_operand.vmem [shape: bf16[8,400], index: 0, kind: input, shape index: {}]   ;;  %s1079_s1 = inlined_call_operand.hbm [shape: bf16[400,128], index: 1, kind: input, shape index: {}]   ;;  %s1080_s2 = inlined_call_operand.vmem [shape: f32[1,128], index: 2, kind: input, shape index: {}]   ;;  %s1081_s3 = inlined_call_operand.vmem [shape: f32[128,128], index: 3, kind: input, shape index: {}]   ;;  %s1082_s4 = inlined_call_operand.vmem [shape: f32[1,128], index: 4, kind: input, shape index: {}]   ;;  %s1083_s5 = inlined_call_operand.vmem [shape: f32[128,10], index: 5, kind: input, shape index: {}]   ;;  %s1084_s6 = inlined_call_operand.vmem [shape: f32[1,10], index: 6, kind: input, shape index: {}]   ;;  %s1085_s7 = inlined_call_operand.hbm [shape: f32[8,10], index: 7, kind: output, shape index: {}]  }
   0x1   :  { %13 = vsyncpa [#allocation4], 0  ;;  %s867_s24 = smov [#allocation2]   ;;  %s819_s28 = scalar_lea.hbm %s1079_s1, 3200 }
   0x2   :  { %s21_s25 = sshll.u32 %s867_s24, 4  ;;  %p820_p0 = scmp.ne.s32.totalorder %s1079_s1, %s819_s28  ;;  %s22_s25 = int_to_ptr.vmem [resolvable:$true] %s21_s25 }
   0x3   :  { %p823_p1 = scmp.lt.u32.totalorder %s819_s28, %s1079_s1 }
   0x5   :  { %p825_p2 = pnand %p823_p1, %p820_p0 }
   0x7   :  { %828 = shalt.err (!%p825_p2)
}
   0x8   :  { %s829_s10 = scalar_lea.vmem %s22_s25, 3200  ;;  %p834_p4 = scmp.lt.s32.totalorder %s22_s25, %s22_s25 }
   0x9   :  { %p830_p3 = scmp.ne.s32.totalorder %s22_s25, %s829_s10  ;;  %p835_p5 = scmp.lt.s32.totalorder %s829_s10, %s829_s10 }
   0xb   :  { %p836_p6 = por %p835_p5, %p834_p4 }
   0xd   :  { %p837_p7 = pnand %p836_p6, %p830_p3 }
   0xf   :  { %840 = shalt.err (!%p837_p7)
}
  0x10   :  { %s868_s11 = smov 64   ;;  %s869_s12 = smov 4  }
  0x11   :  { %27 = dma.hbm_to_vmem [thread:$0]  %s1079_s1, 3200, %s22_s25, [#allocation3], %s868_s11, %s868_s11, %s869_s12  }
  0x12   :  { %863 = dma.done.wait [#allocation3], 3200  }
  0x13   :  { %864 = vsyncadd [#allocation3], 4294964096  ;;  %v870_v0 = vmov 0   ;;  %v786_v1 = vld [vmem:[#allocation2 + $0x40] sm:$0xff]   ;;  %v789_v4 = vld [vmem:[#allocation2 + $0x48] sm:$0xff]   ;;  %vm264_vm0 = vcmask 130048  }
  0x14   :  { %308 = vmatprep.subr.bf16.mxu1 %v870_v0  ;;  %v787_v2 = vld [vmem:[#allocation2 + $0x80] sm:$0xff]   ;;  %604 = vmatprep.subr.bf16.mxu0 %v786_v1  ;;  %v790_v5 = vld [vmem:[#allocation2 + $0x88] sm:$0xff]   ;;  %v792_v7 = vld [vmem:[#allocation2 + $0x50] sm:$0xff]   ;;  %v871_v34 = vmov 0.0|0.0   ;;  %vm872_vm1 = vmmov 0   ;;  %v873_v57 = vmov 0.0  }
  0x15   :  { %v788_v3 = vld [vmem:[#allocation2] sm:$0xff]   ;;  %309 = vmatpush1.bf16.msra.mxu1 %v787_v2  ;;  %v791_v6 = vld [vmem:[#allocation2 + $0x8] sm:$0xff]   ;;  %v793_v8 = vld [vmem:[#allocation2 + $0x90] sm:$0xff]   ;;  %vm543_vm5 = vcmask 80896  }
  0x16   :  { %605 = vmatpush3.bf16.msra.mxu0 %v788_v3  ;;  %310 = vmatprep.subr.bf16.mxu1 %v870_v0  ;;  %v794_v9 = vld [vmem:[#allocation2 + $0x10] sm:$0xff]   ;;  %v795_v10 = vld [vmem:[#allocation2 + $0x58] sm:$0xff]   ;;  %v798_v13 = vld [vmem:[#allocation2 + $0x60] sm:$0xff]  }
  0x17   :  { %606 = vmatprep.subr.bf16.mxu0 %v789_v4  ;;  %v796_v11 = vld [vmem:[#allocation2 + $0x98] sm:$0xff]   ;;  %v799_v14 = vld [vmem:[#allocation2 + $0xa0] sm:$0xff]   ;;  %v801_v16 = vld [vmem:[#allocation2 + $0x68] sm:$0xff]  }
  0x18   :  { %v797_v12 = vld [vmem:[#allocation2 + $0x18] sm:$0xff]   ;;  %v800_v15 = vld [vmem:[#allocation2 + $0x20] sm:$0xff]   ;;  %v802_v17 = vld [vmem:[#allocation2 + $0xa8] sm:$0xff]  }
  0x19   :  { %311 = vmatpush1.bf16.msra.mxu1 %v790_v5  ;;  %v803_v18 = vld [vmem:[#allocation2 + $0x28] sm:$0xff]   ;;  %v804_v19 = vld [vmem:[#allocation2 + $0x70] sm:$0xff]   ;;  %v42_v22 = vld [vmem:[%s1078_s0] sm:$0xff] }
  0x1a   :  { %607 = vmatpush3.bf16.msra.mxu0 %v791_v6  ;;  %312 = vmatprep.subr.bf16.mxu1 %v870_v0  ;;  %v805_v20 = vld [vmem:[#allocation2 + $0xb0] sm:$0xff]   ;;  %v807_v23 = vld [vmem:[#allocation2 + $0x78] sm:$0xff]   ;;  %v573_v24 = vcombine.high %v42_v22, %v42_v22  ;;  %v43_v25 = vld [vmem:[%s1078_s0 + $0x8] sm:$0xff]  ;;  %v572_v31 = vcombine.low %v42_v22, %v42_v22 }
  0x1b   :  { %608 = vmatprep.subr.bf16.mxu0 %v792_v7  ;;  %v806_v21 = vld [vmem:[#allocation2 + $0x30] sm:$0xff]   ;;  %v575_v26 = vcombine.high %v43_v25, %v43_v25  ;;  %v808_v27 = vld [vmem:[#allocation2 + $0xb8] sm:$0xff]   ;;  %v351_v29 = vld [vmem:[%s1081_s3] sm:$0xff]  ;;  %v574_v37 = vcombine.low %v43_v25, %v43_v25 }
  0x1c   :  { %300 = vmatprep.mubr.bf16.mxu0 %v573_v24  ;;  %v809_v28 = vld [vmem:[#allocation2 + $0x38] sm:$0xff]   ;;  %v352_v30 = vld [vmem:[%s1081_s3 + $0x8] sm:$0xff]  ;;  %v812_v32 = vld [vmem:[#allocation2 + $0xc0] sm:$0xff]  }
  0x1d   :  { %313 = vmatpush1.bf16.msra.mxu1 %v793_v8  ;;  %601 = vmatprep.mubr.msk.bf16.mxu1 %vm264_vm0, %v575_v26  ;;  %v731_v33 = vpack.c.bf16 %v352_v30, %v351_v29  ;;  %v353_v35 = vld [vmem:[%s1081_s3 + $0x10] sm:$0xff]  ;;  %v354_v36 = vld [vmem:[%s1081_s3 + $0x18] sm:$0xff]  ;;  %v355_v39 = vld [vmem:[%s1081_s3 + $0x20] sm:$0xff] }
  0x1e   :  { %609 = vmatpush3.bf16.msra.mxu0 %v794_v9  ;;  %314 = vmatprep.subr.bf16.mxu1 %v870_v0  ;;  %v734_v38 = vpack.c.bf16 %v354_v36, %v353_v35  ;;  %v356_v40 = vld [vmem:[%s1081_s3 + $0x28] sm:$0xff]  ;;  %v357_v42 = vld [vmem:[%s1081_s3 + $0x30] sm:$0xff]  ;;  %v358_v43 = vld [vmem:[%s1081_s3 + $0x38] sm:$0xff] }
  0x1f   :  { %610 = vmatprep.subr.bf16.mxu0 %v795_v10  ;;  %v737_v41 = vpack.c.bf16 %v356_v40, %v355_v39  ;;  %v740_v44 = vpack.c.bf16 %v358_v43, %v357_v42  ;;  %v359_v45 = vld [vmem:[%s1081_s3 + $0x40] sm:$0xff]  ;;  %v360_v46 = vld [vmem:[%s1081_s3 + $0x48] sm:$0xff]  ;;  %v361_v48 = vld [vmem:[%s1081_s3 + $0x50] sm:$0xff] }
  0x20   :  { %v743_v47 = vpack.c.bf16 %v360_v46, %v359_v45  ;;  %v362_v49 = vld [vmem:[%s1081_s3 + $0x58] sm:$0xff]  ;;  %v363_v51 = vld [vmem:[%s1081_s3 + $0x60] sm:$0xff]  ;;  %v364_v52 = vld [vmem:[%s1081_s3 + $0x68] sm:$0xff] }
  0x21   :  { %315 = vmatpush1.bf16.msra.mxu1 %v796_v11  ;;  %v746_v50 = vpack.c.bf16 %v362_v49, %v361_v48  ;;  %v749_v53 = vpack.c.bf16 %v364_v52, %v363_v51  ;;  %v365_v54 = vld [vmem:[%s1081_s3 + $0x70] sm:$0xff]  ;;  %v366_v55 = vld [vmem:[%s1081_s3 + $0x78] sm:$0xff]  ;;  %v447_v58 = vld [vmem:[%s1083_s5] sm:$0xff] }
  0x22   :  { %611 = vmatpush3.bf16.msra.mxu0 %v797_v12  ;;  %316 = vmatprep.subr.bf16.mxu1 %v870_v0  ;;  %v752_v56 = vpack.c.bf16 %v366_v55, %v365_v54  ;;  %v448_v59 = vld [vmem:[%s1083_s5 + $0x8] sm:$0xff]  ;;  %v449_v60 = vld [vmem:[%s1083_s5 + $0x10] sm:$0xff]  ;;  %v450_v62 = vld [vmem:[%s1083_s5 + $0x18] sm:$0xff] }
  0x23   :  { %612 = vmatprep.subr.bf16.mxu0 %v798_v13  ;;  %v755_v61 = vpack.c.bf16 %v448_v59, %v447_v58  ;;  %v758_v63 = vpack.c.bf16 %v450_v62, %v449_v60  ;;  %v452_v1 = vld [vmem:[%s1083_s5 + $0x28] sm:$0xff]  ;;  %v453_v3 = vld [vmem:[%s1083_s5 + $0x30] sm:$0xff]  ;;  %v454_v4 = vld [vmem:[%s1083_s5 + $0x38] sm:$0xff] }
  0x24   :  { %v764_v5 = vpack.c.bf16 %v454_v4, %v453_v3  ;;  %v455_v6 = vld [vmem:[%s1083_s5 + $0x40] sm:$0xff]  ;;  %v456_v7 = vld [vmem:[%s1083_s5 + $0x48] sm:$0xff]  ;;  %v457_v9 = vld [vmem:[%s1083_s5 + $0x50] sm:$0xff] }
  0x25   :  { %317 = vmatpush1.bf16.msra.mxu1 %v799_v14  ;;  %v767_v8 = vpack.c.bf16 %v456_v7, %v455_v6  ;;  %v458_v10 = vld [vmem:[%s1083_s5 + $0x58] sm:$0xff]  ;;  %v459_v12 = vld [vmem:[%s1083_s5 + $0x60] sm:$0xff]  ;;  %v460_v13 = vld [vmem:[%s1083_s5 + $0x68] sm:$0xff] }
  0x26   :  { %613 = vmatpush3.bf16.msra.mxu0 %v800_v15  ;;  %318 = vmatprep.subr.bf16.mxu1 %v870_v0  ;;  %v770_v11 = vpack.c.bf16 %v458_v10, %v457_v9  ;;  %v773_v14 = vpack.c.bf16 %v460_v13, %v459_v12  ;;  %v461_v29 = vld [vmem:[%s1083_s5 + $0x70] sm:$0xff]  ;;  %v462_v30 = vld [vmem:[%s1083_s5 + $0x78] sm:$0xff] }
  0x27   :  { %614 = vmatprep.subr.bf16.mxu0 %v801_v16 }
  0x29   :  { %319 = vmatpush1.bf16.msra.mxu1 %v802_v17  ;;  %v571_v17 = vld [vmem:[%s1080_s2] ss:$0 sm:$0xff] }
  0x2a   :  { %615 = vmatpush3.bf16.msra.mxu0 %v803_v18  ;;  %320 = vmatprep.subr.bf16.mxu1 %v870_v0 }
  0x2b   :  { %616 = vmatprep.subr.bf16.mxu0 %v804_v19 }
  0x2d   :  { %321 = vmatpush1.bf16.msra.mxu1 %v805_v20 }
  0x2e   :  { %617 = vmatpush3.bf16.msra.mxu0 %v806_v21  ;;  %322 = vmatprep.subr.bf16.mxu1 %v870_v0 }
  0x2f   :  { %618 = vmatprep.subr.bf16.mxu0 %v807_v23 }
  0x31   :  { %323 = vmatpush1.bf16.msra.mxu1 %v808_v27 }
  0x32   :  { %619 = vmatpush3.bf16.msra.mxu0 %v809_v28  ;;  %324 = vmatprep.subr.bf16.mxu1 %v870_v0  ;;  %v451_v0 = vld [vmem:[%s1083_s5 + $0x20] sm:$0xff] }
  0x33   :  { %730 = vmatprep.subr.bf16.mxu0 %v871_v34  ;;  %v761_v2 = vpack.c.bf16 %v452_v1, %v451_v0 }
  0x35   :  { %301 = vmatmul.mubr.bf16.vlgmr.msra.gmra.mrb[0].mxu0 %v572_v31  ;;  %325 = vmatpush1.bf16.msra.mxu1 %v812_v32  ;;  %v776_v31 = vpack.c.bf16 %v462_v30, %v461_v29  ;;  %v602_v32 = vld [vmem:[%s1082_s4] ss:$0 sm:$0xff]  ;;  %s874_s4 = smov [#allocation5]  }
  0x36   :  { %732 = vmatpush3.bf16.msra.mxu0 %v731_v33  ;;  %754 = vmatprep.subr.bf16.mxu1 %v871_v34  ;;  %s562_s5 = sshll.u32 %s874_s4, 4  ;;  %s563_s5 = int_to_ptr.vmem [resolvable:$true] %s562_s5 }
  0x37   :  { %733 = vmatprep.subr.bf16.mxu0 %v871_v34  ;;  %692 = vmatprep.mubr.msk.f32.mxu0 %vm872_vm1, %v873_v57  ;;  %p846_p9 = scmp.lt.s32.totalorder %s563_s5, %s563_s5 }
  0x38   :  { %341 = vmatmul.mubr.bf16.vlgmr.msra.gmra.mrb[0].mxu1 %v574_v37 }
  0x39   :  { %727 = vmatprep.mubr.msk.f32.mxu1 %vm872_vm1, %v873_v57  ;;  %756 = vmatpush3.bf16.msra.mxu1 %v755_v61 }
  0x3a   :  { %735 = vmatpush3.bf16.msra.mxu0 %v734_v38  ;;  %757 = vmatprep.subr.bf16.mxu1 %v871_v34  ;;  %v603_v38 = vld [vmem:[%s1084_s6] ss:$0 sm:$0xff]  ;;  %s841_s6 = scalar_lea.vmem %s563_s5, 128 }
  0x3b   :  { %736 = vmatprep.subr.bf16.mxu0 %v871_v34  ;;  %p842_p8 = scmp.ne.s32.totalorder %s563_s5, %s841_s6  ;;  %p847_p10 = scmp.lt.s32.totalorder %s841_s6, %s841_s6 }
  0x3d   :  { %759 = vmatpush3.bf16.msra.mxu1 %v758_v63  ;;  %p848_p11 = por %p847_p10, %p846_p9 }
  0x3e   :  { %738 = vmatpush3.bf16.msra.mxu0 %v737_v41  ;;  %760 = vmatprep.subr.bf16.mxu1 %v871_v34 }
  0x3f   :  { %739 = vmatprep.subr.bf16.mxu0 %v871_v34  ;;  %p849_p12 = pnand %p848_p11, %p842_p8 }
  0x41   :  { %762 = vmatpush3.bf16.msra.mxu1 %v761_v2 }
  0x42   :  { %741 = vmatpush3.bf16.msra.mxu0 %v740_v44  ;;  %763 = vmatprep.subr.bf16.mxu1 %v871_v34 }
  0x43   :  { %742 = vmatprep.subr.bf16.mxu0 %v871_v34 }
  0x45   :  { %765 = vmatpush3.bf16.msra.mxu1 %v764_v5 }
  0x46   :  { %744 = vmatpush3.bf16.msra.mxu0 %v743_v47  ;;  %766 = vmatprep.subr.bf16.mxu1 %v871_v34 }
  0x47   :  { %745 = vmatprep.subr.bf16.mxu0 %v871_v34 }
  0x49   :  { %768 = vmatpush3.bf16.msra.mxu1 %v767_v8 }
  0x4a   :  { %747 = vmatpush3.bf16.msra.mxu0 %v746_v50  ;;  %769 = vmatprep.subr.bf16.mxu1 %v871_v34 }
  0x4b   :  { %748 = vmatprep.subr.bf16.mxu0 %v871_v34 }
  0x4d   :  { %771 = vmatpush3.bf16.msra.mxu1 %v770_v11 }
  0x4e   :  { %750 = vmatpush3.bf16.msra.mxu0 %v749_v53  ;;  %772 = vmatprep.subr.bf16.mxu1 %v871_v34 }
  0x4f   :  { %751 = vmatprep.subr.bf16.mxu0 %v871_v34 }
  0x51   :  { %774 = vmatpush3.bf16.msra.mxu1 %v773_v14 }
  0x52   :  { %753 = vmatpush3.bf16.msra.mxu0 %v752_v56  ;;  %775 = vmatprep.subr.bf16.mxu1 %v871_v34 }
  0x55   :  { %777 = vmatpush3.bf16.msra.mxu1 %v776_v31 }
 0x108   :  { %v620_v15 = vpop.f32.mrb[0].mxu0 }
 0x109   :  { %v621_v16 = vpop.f32.mrb[1].mxu0 }
 0x10a   :  { %v622_v18 = vadd.f32 %v621_v16, %v620_v15  ;;  %v623_v19 = vpop.f32.mrb[2].mxu0 }
 0x10b   :  { %v624_v20 = vpop.f32.mrb[3].mxu0  ;;  %v342_v21 = vpop.f32.mrb[0].mxu1 }
 0x10c   :  { %v303_v22 = vadd.f32 %v622_v18, %v571_v17  ;;  %v344_v23 = vpop.f32.mrb[1].mxu1 }
 0x10d   :  { %v345_v24 = vpop.f32.mrb[2].mxu1 }
 0x10e   :  { %v343_v25 = vadd.f32 %v342_v21, %v303_v22  ;;  %v346_v26 = vpop.f32.mrb[3].mxu1 }
 0x110   :  { %vm348_vm2 = vcmp.ge.f32.partialorder %v343_v25, 0.0  ;;  %v349_v27 = vmul.f32 0.01, %v343_v25 }
 0x112   :  { %v350_v28 = vsel %vm348_vm2, %v343_v25, %v349_v27 }
 0x113   :  { %693 = vmatmul.mubr.f32.vlgmr.msra.gmra.mrb[4].mxu0 %v350_v28 }
 0x1e6   :  { %v440_v33 = vpop.f32.mrb[4].mxu0 }
 0x1e7   :  { %v441_v34 = vadd.f32 %v602_v32, %v440_v33  ;;  %v694_v35 = vpop.f32.mrb[5].mxu0 }
 0x1e9   :  { %vm444_vm3 = vcmp.ge.f32.partialorder %v441_v34, 0.0  ;;  %v445_v36 = vmul.f32 0.01, %v441_v34 }
 0x1eb   :  { %v446_v37 = vsel %vm444_vm3, %v441_v34, %v445_v36 }
 0x1ec   :  { %728 = vmatmul.mubr.f32.vlgmr.msra.gmra.mrb[4].mxu1 %v446_v37 }
 0x2bf   :  { %v536_v39 = vpop.f32.mrb[4].mxu1 }
 0x2c0   :  { %v537_v40 = vadd.f32 %v603_v38, %v536_v39  ;;  %v729_v41 = vpop.f32.mrb[5].mxu1 }
 0x2c2   :  { %v541_v42 = vmul.f32 0.01, %v537_v40  ;;  %vm540_vm4 = vcmp.ge.f32.partialorder %v537_v40, 0.0 }
 0x2c4   :  { %v542_v43 = vsel %vm540_vm4, %v537_v40, %v541_v42 }
 0x2c5   :  { %v544_v44 = vsel %vm543_vm5, %v542_v43, -inf }
 0x2c6   :  { %545 = vmax.xlane.f32.xlu0 %v544_v44 }
 0x353   :  { %v546_v45 = vpop.xlane.xlu0 %545 }
 0x354   :  { %v547_v46 = vsub.f32 %v542_v43, %v546_v45 }
 0x356   :  { %v548_v47 = vmul.f32 1.442695, %v547_v46 }
 0x358   :  { %815 = vpow2.f32 %v548_v47 }
 0x362   :  { %v816_v48 = vpop.eup %815 }
 0x363   :  { %v550_v49 = vsel %vm543_vm5, %v816_v48, 0.0 }
 0x364   :  { %551 = vadd.xlane.f32.xlu0 %v550_v49 }
 0x3f1   :  { %v552_v50 = vpop.xlane.xlu0 %551 }
 0x3f2   :  { %817 = vrcp.f32 %v552_v50 }
 0x3fc   :  { %v818_v51 = vpop.eup %817 }
 0x3fd   :  { %v554_v52 = vmul.f32 %v818_v51, %v816_v48 }
 0x3ff   :  { %555 = vst.msk [vmem:[#allocation5] sm:$0xff] %vm543_vm5, %v554_v52 }
 0x400   :  { %852 = shalt.err (!%p849_p12)
}
 0x401   :  { %s853_s13 = scalar_lea.hbm %s1085_s7, 128 }
 0x402   :  { %p854_p13 = scmp.ne.s32.totalorder %s1085_s7, %s853_s13  ;;  %p857_p0 = scmp.lt.u32.totalorder %s853_s13, %s1085_s7 }
 0x404   :  { %p859_p1 = pnand %p857_p0, %p854_p13 }
 0x406   :  { %862 = shalt.err (!%p859_p1)
}
 0x407   :  { %565 = dma.vmem_to_hbm [thread:$0]  %s563_s5, 128, %s1085_s7, [#allocation4]  }
 0x408   :  { %865 = dma.done.wait [#allocation4], 128  }
 0x409   :  { %866 = vsyncadd [#allocation4], 4294967168 }
 0x40a   :  { %569 = vsyncpa [#allocation3], 1 }
 0x40b   :  { %570 = vsyncpa [#allocation4], 1 }

</bundles_post_ra>
